<compile_context>
chip_gen: v7x
topology: tpu7x:2x2x1
jax: 0.10.0
libtpu: 0.0.40
codegen_flags: <defaults>
</compile_context>

<pallas_src>
import functools

import jax
import jax.numpy as jnp
from jax import lax
from jax.experimental import pallas as pl
from jax.experimental.pallas import tpu as pltpu


def _basic_block_kernel(x_ref, t1_ref, t2_ref, o1_ref, o2_ref, out_ref, *,
                        img_h, hp, images, c, tile_w, n_w_tiles):
    """One grid step: `images` stacked zero-padded images, full height, full width.

    Block shapes per grid step g:
      x_ref : (images*hp, (W+4)*C)      2-row / 2-col zero halo per image, lane-dense
      t1_ref: (3, (TW+4)*C, (TW+2)*C)   conv1 banded slabs (BN1 scale folded in)
      t2_ref: (3, (TW+2)*C, TW*C)       conv2 banded slabs (BN2 scale folded in)
      o1_ref: (1, (TW+2)*C)             BN1 offset tiled across the width tile (f32)
      o2_ref: (1, TW*C)                 BN2 offset tiled across the width tile (f32)
      out_ref: (images*H, W*C)
    """
    rg = images * hp
    m1 = rg - 2                       # conv1 / intermediate rows (1-row halo kept)
    m2 = rg - 4                       # conv2 output rows (data rows sliced per image)
    in_c = (tile_w + 4) * c
    mid_c = (tile_w + 2) * c
    twc = tile_w * c

    # Intermediate rows that are real image rows; everything else (conv2's zero
    # H-padding rows and the inter-image gap rows) must be zero.  Built once per step.
    center = lax.broadcasted_iota(jnp.int32, (m1, 1), 0) + 1
    rr = center % hp
    row_keep = (rr >= 2) & (rr < img_h + 2)

    for t in range(n_w_tiles):                         # static, unrolled width tiles
        c0 = t * twc                                   # static lane offset of the tile

        # ---- conv1 (3x3, pad=1) + BN1 + ReLU over TW+2 columns (1-col halo) ----
        # kw taps + W padding live in the banded slab -> 3 fat MXU matmuls per conv;
        # the shifted row windows are read straight from the ref (spare load slots).
        acc1 = jnp.dot(x_ref[0:m1, c0:c0 + in_c], t1_ref[0],
                       preferred_element_type=jnp.float32)
        for kh in (1, 2):
            acc1 += jnp.dot(x_ref[kh:kh + m1, c0:c0 + in_c], t1_ref[kh],
                            preferred_element_type=jnp.float32)
        y = jnp.maximum(acc1 + o1_ref[...], 0.0)
        y = jnp.where(row_keep, y, 0.0)
        if t == 0:                                     # halo column -1 is outside image
            col = lax.broadcasted_iota(jnp.int32, (1, mid_c), 1)
            y = jnp.where(col >= c, y, 0.0)
        if t == n_w_tiles - 1:                         # halo column W is outside image
            col = lax.broadcasted_iota(jnp.int32, (1, mid_c), 1)
            y = jnp.where(col < (tile_w + 1) * c, y, 0.0)
        y = y.astype(x_ref.dtype)

        # ---- conv2 (3x3, pad=1) + BN2 ----
        acc2 = jnp.dot(y[0:m2, :], t2_ref[0], preferred_element_type=jnp.float32)
        for kh in (1, 2):
            acc2 += jnp.dot(y[kh:kh + m2, :], t2_ref[kh],
                            preferred_element_type=jnp.float32)
        z = acc2 + o2_ref[...]

        # ---- identity residual + ReLU; store only real image rows (drop pad/gap) ----
        for b in range(images):
            r0 = b * hp
            # TODO(synk): pass an f32 copy of the identity rows if bit-exact skip
            # connections are required in the bf16-operand path.
            ident = x_ref[r0 + 2:r0 + 2 + img_h,
                          c0 + 2 * c:c0 + 2 * c + twc].astype(jnp.float32)
            out_ref[b * img_h:(b + 1) * img_h, c0:c0 + twc] = jnp.maximum(
                z[r0:r0 + img_h, :] + ident, 0.0).astype(out_ref.dtype)


def _banded_slabs(w_oihw, scale, n_out):
    """3x3 stride-1 conv over `n_out` output width positions, fed by n_out+2 input
    positions (1-column halo), as 3 block-Toeplitz slabs T[kh] of shape
    ((n_out+2)*Cin, n_out*Cout):
        T[kh][(v+kw)*Cin + ci, v*Cout + co] = w[co, ci, kh, kw] * scale[co]
    The per-out-channel BN scale is folded in; boundary zeros come from the
    zero-padded input columns, so no band entries are dropped."""
    ws = (w_oihw * scale[:, None, None, None]).astype(jnp.float32)  # (Cout, Cin, 3, 3)
    cout, cin = ws.shape[0], ws.shape[1]
    n_in = n_out + 2
    slabs = []
    for kh in range(3):
        t = jnp.zeros((n_in * cin, n_out * cout), jnp.float32)
        for kw in range(3):
            band = jnp.eye(n_in, n_out, k=-kw, dtype=jnp.float32)
            t = t + jnp.kron(band, ws[:, :, kh, kw].T)
        slabs.append(t)
    return jnp.stack(slabs)                                          # (3, n_in*C, n_out*C)


def basic_block_forward(x_nchw, params, *, eps=1e-5, tile_w=None, images_per_step=None,
                        compute_dtype=jnp.bfloat16, out_dtype=jnp.float32):
    """BasicBlock forward (stride=1, downsample=None). x_nchw: (N, C, H, W) f32.

    compute_dtype: MXU operand dtype (bf16 = v5e/v6e/v7x perf config: ~2x MXU rate,
      half the activation/weight DMA bytes; accumulation + epilogue stay f32).
    out_dtype: writeback dtype (use bf16 when chaining blocks to halve HBM traffic).
    tile_w: output columns per in-kernel width tile (default targets TW*C ~ 512 lanes).
    images_per_step: batch images stacked per grid step (default targets M >= ~128
      while keeping >= 2 grid steps so both v7x TensorCores stay busy).
    """
    w1, g1, b1, bm1, bv1 = (params[k] for k in ("w1", "g1", "b1", "m1", "v1"))
    w2, g2, b2, bm2, bv2 = (params[k] for k in ("w2", "g2", "b2", "m2", "v2"))

    N, Cin, H, W = x_nchw.shape
    Cout = w1.shape[0]
    assert Cin == Cout, "identity residual requires inplanes == planes"
    C = Cout

    hp = -(-(H + 4) // 8) * 8                    # padded rows per image (multiple of 8)

    if tile_w is None:
        limit = min(W, max(1, 512 // C))         # target TW*C ~ 512 lanes
        tile_w = max(d for d in range(1, limit + 1) if W % d == 0)
    assert W % tile_w == 0
    n_w_tiles = W // tile_w

    if images_per_step is None:
        gb = max(1, 128 // hp)                   # MXU M >= ~128 after stacking
        if N >= 2:
            gb = max(1, min(gb, N // 2))         # keep >= 2 grid steps (megacore)
        while N % gb:
            gb -= 1
    else:
        gb = images_per_step
    assert N % gb == 0
    grid_n = N // gb

    # Fold BatchNorm (inference): scale into the conv weights, offset stays (f32).
    s1 = g1 / jnp.sqrt(bv1 + eps)
    o1 = b1 - bm1 * s1
    s2 = g2 / jnp.sqrt(bv2 + eps)
    o2 = b2 - bm2 * s2

    t1 = _banded_slabs(w1, s1, tile_w + 2).astype(compute_dtype)   # (3,(TW+4)C,(TW+2)C)
    t2 = _banded_slabs(w2, s2, tile_w).astype(compute_dtype)       # (3,(TW+2)C, TW*C)
    o1_row = jnp.tile(o1, tile_w + 2).reshape(1, -1).astype(jnp.float32)
    o2_row = jnp.tile(o2, tile_w).reshape(1, -1).astype(jnp.float32)

    # NCHW -> lane-dense stacked rows (N*hp, (W+4)*C) with per-image zero halos.
    # TODO(synk): when chaining blocks, keep activations in this padded lane-dense
    # layout end-to-end (and have the kernel write it) so this pad/transpose copy
    # happens only once at the stem instead of per block.
    x_nhwc = jnp.transpose(x_nchw, (0, 2, 3, 1))
    xpp = jnp.pad(x_nhwc, ((0, 0), (2, hp - H - 2), (2, 2), (0, 0)))
    xpp = xpp.reshape(N * hp, (W + 4) * C).astype(compute_dtype)

    rg = gb * hp
    wpc = (W + 4) * C
    in_c, mid_c, twc = (tile_w + 4) * C, (tile_w + 2) * C, tile_w * C
    m1, m2 = rg - 2, rg - 4

    itemsize = jnp.dtype(compute_dtype).itemsize
    out_itemsize = jnp.dtype(out_dtype).itemsize
    flops = 2 * grid_n * n_w_tiles * 3 * (m1 * in_c * mid_c + m2 * mid_c * twc)
    bytes_accessed = (xpp.size * itemsize + (t1.size + t2.size) * itemsize
                      + (o1_row.size + o2_row.size) * 4 + N * H * W * C * out_itemsize)
    cost = pl.CostEstimate(flops=flops, transcendentals=0,
                           bytes_accessed=bytes_accessed)

    # VMEM budget from the actual resident set (double-buffered blocks + live f32
    # intermediates) instead of a hard-coded limit.  The weight/offset blocks have a
    # constant block index so they are DMA'd only once.
    # TODO(synk): single-buffer the weight blocks (pipeline_mode=pl.Buffered(1)) to
    # halve their footprint inside v7x's 64 MiB VMEM at real stage shapes.
    resident = (2 * rg * wpc * itemsize
                + 2 * (t1.size + t2.size) * itemsize
                + 2 * (o1_row.size + o2_row.size) * 4
                + 2 * gb * H * W * C * out_itemsize
                + 3 * m1 * mid_c * 4)
    vmem_limit = int(min(64 * 2 ** 20, max(32 * 2 ** 20, int(1.5 * resident))))

    kernel = functools.partial(_basic_block_kernel, img_h=H, hp=hp, images=gb, c=C,
                               tile_w=tile_w, n_w_tiles=n_w_tiles)
    out = pl.pallas_call(
        kernel,
        grid=(grid_n,),
        in_specs=[
            pl.BlockSpec((rg, wpc), lambda g: (g, 0)),
            pl.BlockSpec((3, in_c, mid_c), lambda g: (0, 0, 0)),
            pl.BlockSpec((3, mid_c, twc), lambda g: (0, 0, 0)),
            pl.BlockSpec((1, mid_c), lambda g: (0, 0)),
            pl.BlockSpec((1, twc), lambda g: (0, 0)),
        ],
        out_specs=pl.BlockSpec((gb * H, W * C), lambda g: (g, 0)),
        out_shape=jax.ShapeDtypeStruct((N * H, W * C), out_dtype),
        compiler_params=pltpu.CompilerParams(
            dimension_semantics=("parallel",),
            vmem_limit_bytes=vmem_limit),
        cost_estimate=cost,
    )(xpp, t1, t2, o1_row, o2_row)

    return jnp.transpose(out.reshape(N, H, W, C), (0, 3, 1, 2))     # back to NCHW


# ---------------- pure-JAX reference (for correctness check only) ----------------
def _ref_basic_block(x, params, eps=1e-5):
    def conv3x3(x, w):
        return lax.conv_general_dilated(
            x, w, window_strides=(1, 1), padding=((1, 1), (1, 1)),
            dimension_numbers=("NCHW", "OIHW", "NCHW"))

    def bn(x, g, b, m, v):
        g, b, m, v = (t.reshape(1, -1, 1, 1) for t in (g, b, m, v))
        return (x - m) / jnp.sqrt(v + eps) * g + b

    out = conv3x3(x, params["w1"])
    out = jax.nn.relu(bn(out, params["g1"], params["b1"], params["m1"], params["v1"]))
    out = conv3x3(out, params["w2"])
    out = bn(out, params["g2"], params["b2"], params["m2"], params["v2"])
    return jax.nn.relu(out + x)


if __name__ == "__main__":
    N, C, H, W = 2, 4, 16, 16  # inplanes == planes == 4, stride=1, downsample=None
    key = jax.random.PRNGKey(0)
    ks = jax.random.split(key, 11)

    params = {
        "w1": 0.1 * jax.random.normal(ks[0], (C, C, 3, 3), jnp.float32),
        "g1": 1.0 + 0.1 * jax.random.normal(ks[1], (C,), jnp.float32),
        "b1": 0.1 * jax.random.normal(ks[2], (C,), jnp.float32),
        "m1": 0.1 * jax.random.normal(ks[3], (C,), jnp.float32),
        "v1": 0.5 + jax.random.uniform(ks[4], (C,), jnp.float32),
        "w2": 0.1 * jax.random.normal(ks[5], (C, C, 3, 3), jnp.float32),
        "g2": 1.0 + 0.1 * jax.random.normal(ks[6], (C,), jnp.float32),
        "b2": 0.1 * jax.random.normal(ks[7], (C,), jnp.float32),
        "m2": 0.1 * jax.random.normal(ks[8], (C,), jnp.float32),
        "v2": 0.5 + jax.random.uniform(ks[9], (C,), jnp.float32),
    }
    x = jax.random.normal(ks[10], (N, C, H, W), jnp.float32)

    ref = jax.block_until_ready(_ref_basic_block(x, params))

    # f32 operands, 2 width tiles of 8 columns (exercises the width-tiled banded slabs
    # and the boundary-column masking), one image per step (2 parallel grid steps).
    out = jax.block_until_ready(
        basic_block_forward(x, params, compute_dtype=jnp.float32,
                            tile_w=8, images_per_step=1))
    assert out.shape == (N, C, H, W)
    assert jnp.max(jnp.abs(out - ref)) < 5e-4, "f32 kernel mismatch vs. reference"

    # bf16 matmul operands + bf16 writeback, 2 images stacked per step (exercises the
    # batch-stacked large-M path); loose tolerance reflects bf16 rounding only.
    out_bf16 = jax.block_until_ready(
        basic_block_forward(x, params, compute_dtype=jnp.bfloat16,
                            out_dtype=jnp.bfloat16, images_per_step=2))
    err = jnp.max(jnp.abs(out_bf16.astype(jnp.float32) - ref))
    assert err < 2e-1, "bf16 kernel mismatch vs. reference"

    print("KERNEL_OK")
</pallas_src>

<mosaic_0001>
module attributes {stable_mosaic.version = 11 : i64} {
  func.func @_basic_block_kernel(%arg0: i32, %arg1: memref<24x80xf32, #tpu.memory_space<vmem>>, %arg2: memref<3x48x40xf32, #tpu.memory_space<vmem>>, %arg3: memref<3x40x32xf32, #tpu.memory_space<vmem>>, %arg4: memref<1x40xf32, #tpu.memory_space<vmem>>, %arg5: memref<1x32xf32, #tpu.memory_space<vmem>>, %arg6: memref<16x64xf32, #tpu.memory_space<vmem>>) attributes {dimension_semantics = [#tpu.dimension_semantics<parallel>], iteration_bounds = array<i64: 2>, scalar_prefetch = 0 : i64, scratch_operands = 0 : i64, tpu.core_type = #tpu.core_type<tc>, window_params = [{transform_indices = @transform_0, window_bounds = array<i64: 24, 80>}, {pipeline_mode = #tpu.pipeline_mode<synchronous>, transform_indices = @transform_1, window_bounds = array<i64: 3, 48, 40>}, {pipeline_mode = #tpu.pipeline_mode<synchronous>, transform_indices = @transform_2, window_bounds = array<i64: 3, 40, 32>}, {pipeline_mode = #tpu.pipeline_mode<synchronous>, transform_indices = @transform_3, window_bounds = array<i64: 1, 40>}, {pipeline_mode = #tpu.pipeline_mode<synchronous>, transform_indices = @transform_4, window_bounds = array<i64: 1, 32>}, {transform_indices = @transform_5, window_bounds = array<i64: 16, 64>}]} {
    %0 = tpu.iota {dimensions = array<i32: 0>} : vector<22x1xi32>
    %c1_i32 = arith.constant 1 : i32
    %1 = vector.broadcast %c1_i32 : i32 to vector<22x1xi32>
    %2 = arith.addi %0, %1 : vector<22x1xi32>
    %c24_i32 = arith.constant 24 : i32
    %c0_i32 = arith.constant 0 : i32
    %3 = arith.cmpi eq, %c24_i32, %c0_i32 : i32
    %c1_i32_0 = arith.constant 1 : i32
    %4 = arith.select %3, %c1_i32_0, %c24_i32 : i32
    %5 = vector.broadcast %4 : i32 to vector<22x1xi32>
    %6 = arith.remsi %2, %5 : vector<22x1xi32>
    %c0_i32_1 = arith.constant 0 : i32
    %7 = vector.broadcast %c0_i32_1 : i32 to vector<22x1xi32>
    %8 = arith.cmpi ne, %6, %7 : vector<22x1xi32>
    %c0_i32_2 = arith.constant 0 : i32
    %9 = vector.broadcast %c0_i32_2 : i32 to vector<22x1xi32>
    %10 = arith.cmpi slt, %6, %9 : vector<22x1xi32>
    %c0_i32_3 = arith.constant 0 : i32
    %11 = arith.cmpi slt, %4, %c0_i32_3 : i32
    %12 = vector.broadcast %11 : i1 to vector<22x1xi1>
    %13 = vector.broadcast %12 : vector<22x1xi1> to vector<22x1xi1>
    %14 = arith.xori %10, %13 : vector<22x1xi1>
    %15 = arith.andi %14, %8 : vector<22x1xi1>
    %16 = vector.broadcast %4 : i32 to vector<22x1xi32>
    %17 = arith.addi %6, %16 : vector<22x1xi32>
    %18 = arith.select %15, %17, %6 : vector<22x1xi1>, vector<22x1xi32>
    %c2_i32 = arith.constant 2 : i32
    %19 = vector.broadcast %c2_i32 : i32 to vector<22x1xi32>
    %20 = arith.cmpi sge, %18, %19 : vector<22x1xi32>
    %c18_i32 = arith.constant 18 : i32
    %21 = vector.broadcast %c18_i32 : i32 to vector<22x1xi32>
    %22 = arith.cmpi slt, %18, %21 : vector<22x1xi32>
    %23 = arith.andi %20, %22 : vector<22x1xi1>
    %c0 = arith.constant 0 : index
    %c0_4 = arith.constant 0 : index
    %24 = vector.load %arg1[%c0, %c0_4] : memref<24x80xf32, #tpu.memory_space<vmem>>, vector<22x48xf32>
    %c0_5 = arith.constant 0 : index
    %c0_6 = arith.constant 0 : index
    %c0_7 = arith.constant 0 : index
    %25 = vector.load %arg2[%c0_5, %c0_6, %c0_7] : memref<3x48x40xf32, #tpu.memory_space<vmem>>, vector<1x48x40xf32>
    %26 = vector.shape_cast %25 : vector<1x48x40xf32> to vector<48x40xf32>
    %cst = arith.constant dense<0.000000e+00> : vector<22x40xf32>
    %27 = tpu.matmul %24, %26, %cst {dimension_numbers = #tpu.dot_dimension_numbers<[1], [0], [0], [1], [0, 0, 1, 1], [], []>} : vector<22x48xf32>, vector<48x40xf32>, vector<22x40xf32> -> vector<22x40xf32>
    %c1 = arith.constant 1 : index
    %c0_8 = arith.constant 0 : index
    %28 = vector.load %arg1[%c1, %c0_8] : memref<24x80xf32, #tpu.memory_space<vmem>>, vector<22x48xf32>
    %c1_9 = arith.constant 1 : index
    %c0_10 = arith.constant 0 : index
    %c0_11 = arith.constant 0 : index
    %29 = vector.load %arg2[%c1_9, %c0_10, %c0_11] : memref<3x48x40xf32, #tpu.memory_space<vmem>>, vector<1x48x40xf32>
    %30 = vector.shape_cast %29 : vector<1x48x40xf32> to vector<48x40xf32>
    %cst_12 = arith.constant dense<0.000000e+00> : vector<22x40xf32>
    %31 = tpu.matmul %28, %30, %cst_12 {dimension_numbers = #tpu.dot_dimension_numbers<[1], [0], [0], [1], [0, 0, 1, 1], [], []>} : vector<22x48xf32>, vector<48x40xf32>, vector<22x40xf32> -> vector<22x40xf32>
    %32 = arith.addf %27, %31 : vector<22x40xf32>
    %c2 = arith.constant 2 : index
    %c0_13 = arith.constant 0 : index
    %33 = vector.load %arg1[%c2, %c0_13] : memref<24x80xf32, #tpu.memory_space<vmem>>, vector<22x48xf32>
    %c2_14 = arith.constant 2 : index
    %c0_15 = arith.constant 0 : index
    %c0_16 = arith.constant 0 : index
    %34 = vector.load %arg2[%c2_14, %c0_15, %c0_16] : memref<3x48x40xf32, #tpu.memory_space<vmem>>, vector<1x48x40xf32>
    %35 = vector.shape_cast %34 : vector<1x48x40xf32> to vector<48x40xf32>
    %cst_17 = arith.constant dense<0.000000e+00> : vector<22x40xf32>
    %36 = tpu.matmul %33, %35, %cst_17 {dimension_numbers = #tpu.dot_dimension_numbers<[1], [0], [0], [1], [0, 0, 1, 1], [], []>} : vector<22x48xf32>, vector<48x40xf32>, vector<22x40xf32> -> vector<22x40xf32>
    %37 = arith.addf %32, %36 : vector<22x40xf32>
    %c0_18 = arith.constant 0 : index
    %c0_19 = arith.constant 0 : index
    %38 = vector.load %arg4[%c0_18, %c0_19] : memref<1x40xf32, #tpu.memory_space<vmem>>, vector<1x40xf32>
    %39 = vector.broadcast %38 : vector<1x40xf32> to vector<22x40xf32>
    %40 = arith.addf %37, %39 : vector<22x40xf32>
    %cst_20 = arith.constant 0.000000e+00 : f32
    %41 = vector.broadcast %cst_20 : f32 to vector<22x40xf32>
    %42 = arith.maximumf %40, %41 : vector<22x40xf32>
    %cst_21 = arith.constant 0.000000e+00 : f32
    %43 = vector.shape_cast %23 : vector<22x1xi1> to vector<22x1xi1>
    %44 = vector.broadcast %43 : vector<22x1xi1> to vector<22x40xi1>
    %45 = vector.broadcast %cst_21 : f32 to vector<22x40xf32>
    %46 = arith.select %44, %42, %45 : vector<22x40xi1>, vector<22x40xf32>
    %47 = tpu.iota {dimensions = array<i32: 1>} : vector<1x40xi32>
    %c4_i32 = arith.constant 4 : i32
    %48 = vector.broadcast %c4_i32 : i32 to vector<1x40xi32>
    %49 = arith.cmpi sge, %47, %48 : vector<1x40xi32>
    %cst_22 = arith.constant 0.000000e+00 : f32
    %50 = vector.shape_cast %49 : vector<1x40xi1> to vector<1x40xi1>
    %51 = vector.broadcast %50 : vector<1x40xi1> to vector<22x40xi1>
    %52 = vector.broadcast %cst_22 : f32 to vector<22x40xf32>
    %53 = arith.select %51, %46, %52 : vector<22x40xi1>, vector<22x40xf32>
    %54 = vector.extract_strided_slice %53 {offsets = [0, 0], sizes = [20, 40], strides = [1, 1]} : vector<22x40xf32> to vector<20x40xf32>
    %c0_23 = arith.constant 0 : index
    %c0_24 = arith.constant 0 : index
    %c0_25 = arith.constant 0 : index
    %55 = vector.load %arg3[%c0_23, %c0_24, %c0_25] : memref<3x40x32xf32, #tpu.memory_space<vmem>>, vector<1x40x32xf32>
    %56 = vector.shape_cast %55 : vector<1x40x32xf32> to vector<40x32xf32>
    %cst_26 = arith.constant dense<0.000000e+00> : vector<20x32xf32>
    %57 = tpu.matmul %54, %56, %cst_26 {dimension_numbers = #tpu.dot_dimension_numbers<[1], [0], [0], [1], [0, 0, 1, 1], [], []>} : vector<20x40xf32>, vector<40x32xf32>, vector<20x32xf32> -> vector<20x32xf32>
    %58 = vector.extract_strided_slice %53 {offsets = [1, 0], sizes = [20, 40], strides = [1, 1]} : vector<22x40xf32> to vector<20x40xf32>
    %c1_27 = arith.constant 1 : index
    %c0_28 = arith.constant 0 : index
    %c0_29 = arith.constant 0 : index
    %59 = vector.load %arg3[%c1_27, %c0_28, %c0_29] : memref<3x40x32xf32, #tpu.memory_space<vmem>>, vector<1x40x32xf32>
    %60 = vector.shape_cast %59 : vector<1x40x32xf32> to vector<40x32xf32>
    %cst_30 = arith.constant dense<0.000000e+00> : vector<20x32xf32>
    %61 = tpu.matmul %58, %60, %cst_30 {dimension_numbers = #tpu.dot_dimension_numbers<[1], [0], [0], [1], [0, 0, 1, 1], [], []>} : vector<20x40xf32>, vector<40x32xf32>, vector<20x32xf32> -> vector<20x32xf32>
    %62 = arith.addf %57, %61 : vector<20x32xf32>
    %63 = vector.extract_strided_slice %53 {offsets = [2, 0], sizes = [20, 40], strides = [1, 1]} : vector<22x40xf32> to vector<20x40xf32>
    %c2_31 = arith.constant 2 : index
    %c0_32 = arith.constant 0 : index
    %c0_33 = arith.constant 0 : index
    %64 = vector.load %arg3[%c2_31, %c0_32, %c0_33] : memref<3x40x32xf32, #tpu.memory_space<vmem>>, vector<1x40x32xf32>
    %65 = vector.shape_cast %64 : vector<1x40x32xf32> to vector<40x32xf32>
    %cst_34 = arith.constant dense<0.000000e+00> : vector<20x32xf32>
    %66 = tpu.matmul %63, %65, %cst_34 {dimension_numbers = #tpu.dot_dimension_numbers<[1], [0], [0], [1], [0, 0, 1, 1], [], []>} : vector<20x40xf32>, vector<40x32xf32>, vector<20x32xf32> -> vector<20x32xf32>
    %67 = arith.addf %62, %66 : vector<20x32xf32>
    %c0_35 = arith.constant 0 : index
    %c0_36 = arith.constant 0 : index
    %68 = vector.load %arg5[%c0_35, %c0_36] : memref<1x32xf32, #tpu.memory_space<vmem>>, vector<1x32xf32>
    %69 = vector.broadcast %68 : vector<1x32xf32> to vector<20x32xf32>
    %70 = arith.addf %67, %69 : vector<20x32xf32>
    %c2_37 = arith.constant 2 : index
    %c8 = arith.constant 8 : index
    %71 = vector.load %arg1[%c2_37, %c8] : memref<24x80xf32, #tpu.memory_space<vmem>>, vector<16x32xf32>
    %72 = vector.extract_strided_slice %70 {offsets = [0, 0], sizes = [16, 32], strides = [1, 1]} : vector<20x32xf32> to vector<16x32xf32>
    %73 = arith.addf %72, %71 : vector<16x32xf32>
    %cst_38 = arith.constant 0.000000e+00 : f32
    %74 = vector.broadcast %cst_38 : f32 to vector<16x32xf32>
    %75 = arith.maximumf %73, %74 : vector<16x32xf32>
    %c0_39 = arith.constant 0 : index
    %c0_40 = arith.constant 0 : index
    %76 = vector.load %arg6[%c0_39, %c0_40] : memref<16x64xf32, #tpu.memory_space<vmem>>, vector<16x32xf32>
    tpu.vector_store %arg6[%c0_39, %c0_40], %75 {strides = array<i32>} : memref<16x64xf32, #tpu.memory_space<vmem>>, vector<16x32xf32>,
    %c0_41 = arith.constant 0 : index
    %c32 = arith.constant 32 : index
    %77 = vector.load %arg1[%c0_41, %c32] : memref<24x80xf32, #tpu.memory_space<vmem>>, vector<22x48xf32>
    %c0_42 = arith.constant 0 : index
    %c0_43 = arith.constant 0 : index
    %c0_44 = arith.constant 0 : index
    %78 = vector.load %arg2[%c0_42, %c0_43, %c0_44] : memref<3x48x40xf32, #tpu.memory_space<vmem>>, vector<1x48x40xf32>
    %79 = vector.shape_cast %78 : vector<1x48x40xf32> to vector<48x40xf32>
    %cst_45 = arith.constant dense<0.000000e+00> : vector<22x40xf32>
    %80 = tpu.matmul %77, %79, %cst_45 {dimension_numbers = #tpu.dot_dimension_numbers<[1], [0], [0], [1], [0, 0, 1, 1], [], []>} : vector<22x48xf32>, vector<48x40xf32>, vector<22x40xf32> -> vector<22x40xf32>
    %c1_46 = arith.constant 1 : index
    %c32_47 = arith.constant 32 : index
    %81 = vector.load %arg1[%c1_46, %c32_47] : memref<24x80xf32, #tpu.memory_space<vmem>>, vector<22x48xf32>
    %c1_48 = arith.constant 1 : index
    %c0_49 = arith.constant 0 : index
    %c0_50 = arith.constant 0 : index
    %82 = vector.load %arg2[%c1_48, %c0_49, %c0_50] : memref<3x48x40xf32, #tpu.memory_space<vmem>>, vector<1x48x40xf32>
    %83 = vector.shape_cast %82 : vector<1x48x40xf32> to vector<48x40xf32>
    %cst_51 = arith.constant dense<0.000000e+00> : vector<22x40xf32>
    %84 = tpu.matmul %81, %83, %cst_51 {dimension_numbers = #tpu.dot_dimension_numbers<[1], [0], [0], [1], [0, 0, 1, 1], [], []>} : vector<22x48xf32>, vector<48x40xf32>, vector<22x40xf32> -> vector<22x40xf32>
    %85 = arith.addf %80, %84 : vector<22x40xf32>
    %c2_52 = arith.constant 2 : index
    %c32_53 = arith.constant 32 : index
    %86 = vector.load %arg1[%c2_52, %c32_53] : memref<24x80xf32, #tpu.memory_space<vmem>>, vector<22x48xf32>
    %c2_54 = arith.constant 2 : index
    %c0_55 = arith.constant 0 : index
    %c0_56 = arith.constant 0 : index
    %87 = vector.load %arg2[%c2_54, %c0_55, %c0_56] : memref<3x48x40xf32, #tpu.memory_space<vmem>>, vector<1x48x40xf32>
    %88 = vector.shape_cast %87 : vector<1x48x40xf32> to vector<48x40xf32>
    %cst_57 = arith.constant dense<0.000000e+00> : vector<22x40xf32>
    %89 = tpu.matmul %86, %88, %cst_57 {dimension_numbers = #tpu.dot_dimension_numbers<[1], [0], [0], [1], [0, 0, 1, 1], [], []>} : vector<22x48xf32>, vector<48x40xf32>, vector<22x40xf32> -> vector<22x40xf32>
    %90 = arith.addf %85, %89 : vector<22x40xf32>
    %c0_58 = arith.constant 0 : index
    %c0_59 = arith.constant 0 : index
    %91 = vector.load %arg4[%c0_58, %c0_59] : memref<1x40xf32, #tpu.memory_space<vmem>>, vector<1x40xf32>
    %92 = vector.broadcast %91 : vector<1x40xf32> to vector<22x40xf32>
    %93 = arith.addf %90, %92 : vector<22x40xf32>
    %cst_60 = arith.constant 0.000000e+00 : f32
    %94 = vector.broadcast %cst_60 : f32 to vector<22x40xf32>
    %95 = arith.maximumf %93, %94 : vector<22x40xf32>
    %cst_61 = arith.constant 0.000000e+00 : f32
    %96 = vector.shape_cast %23 : vector<22x1xi1> to vector<22x1xi1>
    %97 = vector.broadcast %96 : vector<22x1xi1> to vector<22x40xi1>
    %98 = vector.broadcast %cst_61 : f32 to vector<22x40xf32>
    %99 = arith.select %97, %95, %98 : vector<22x40xi1>, vector<22x40xf32>
    %100 = tpu.iota {dimensions = array<i32: 1>} : vector<1x40xi32>
    %c36_i32 = arith.constant 36 : i32
    %101 = vector.broadcast %c36_i32 : i32 to vector<1x40xi32>
    %102 = arith.cmpi slt, %100, %101 : vector<1x40xi32>
    %cst_62 = arith.constant 0.000000e+00 : f32
    %103 = vector.shape_cast %102 : vector<1x40xi1> to vector<1x40xi1>
    %104 = vector.broadcast %103 : vector<1x40xi1> to vector<22x40xi1>
    %105 = vector.broadcast %cst_62 : f32 to vector<22x40xf32>
    %106 = arith.select %104, %99, %105 : vector<22x40xi1>, vector<22x40xf32>
    %107 = vector.extract_strided_slice %106 {offsets = [0, 0], sizes = [20, 40], strides = [1, 1]} : vector<22x40xf32> to vector<20x40xf32>
    %c0_63 = arith.constant 0 : index
    %c0_64 = arith.constant 0 : index
    %c0_65 = arith.constant 0 : index
    %108 = vector.load %arg3[%c0_63, %c0_64, %c0_65] : memref<3x40x32xf32, #tpu.memory_space<vmem>>, vector<1x40x32xf32>
    %109 = vector.shape_cast %108 : vector<1x40x32xf32> to vector<40x32xf32>
    %cst_66 = arith.constant dense<0.000000e+00> : vector<20x32xf32>
    %110 = tpu.matmul %107, %109, %cst_66 {dimension_numbers = #tpu.dot_dimension_numbers<[1], [0], [0], [1], [0, 0, 1, 1], [], []>} : vector<20x40xf32>, vector<40x32xf32>, vector<20x32xf32> -> vector<20x32xf32>
    %111 = vector.extract_strided_slice %106 {offsets = [1, 0], sizes = [20, 40], strides = [1, 1]} : vector<22x40xf32> to vector<20x40xf32>
    %c1_67 = arith.constant 1 : index
    %c0_68 = arith.constant 0 : index
    %c0_69 = arith.constant 0 : index
    %112 = vector.load %arg3[%c1_67, %c0_68, %c0_69] : memref<3x40x32xf32, #tpu.memory_space<vmem>>, vector<1x40x32xf32>
    %113 = vector.shape_cast %112 : vector<1x40x32xf32> to vector<40x32xf32>
    %cst_70 = arith.constant dense<0.000000e+00> : vector<20x32xf32>
    %114 = tpu.matmul %111, %113, %cst_70 {dimension_numbers = #tpu.dot_dimension_numbers<[1], [0], [0], [1], [0, 0, 1, 1], [], []>} : vector<20x40xf32>, vector<40x32xf32>, vector<20x32xf32> -> vector<20x32xf32>
    %115 = arith.addf %110, %114 : vector<20x32xf32>
    %116 = vector.extract_strided_slice %106 {offsets = [2, 0], sizes = [20, 40], strides = [1, 1]} : vector<22x40xf32> to vector<20x40xf32>
    %c2_71 = arith.constant 2 : index
    %c0_72 = arith.constant 0 : index
    %c0_73 = arith.constant 0 : index
    %117 = vector.load %arg3[%c2_71, %c0_72, %c0_73] : memref<3x40x32xf32, #tpu.memory_space<vmem>>, vector<1x40x32xf32>
    %118 = vector.shape_cast %117 : vector<1x40x32xf32> to vector<40x32xf32>
    %cst_74 = arith.constant dense<0.000000e+00> : vector<20x32xf32>
    %119 = tpu.matmul %116, %118, %cst_74 {dimension_numbers = #tpu.dot_dimension_numbers<[1], [0], [0], [1], [0, 0, 1, 1], [], []>} : vector<20x40xf32>, vector<40x32xf32>, vector<20x32xf32> -> vector<20x32xf32>
    %120 = arith.addf %115, %119 : vector<20x32xf32>
    %c0_75 = arith.constant 0 : index
    %c0_76 = arith.constant 0 : index
    %121 = vector.load %arg5[%c0_75, %c0_76] : memref<1x32xf32, #tpu.memory_space<vmem>>, vector<1x32xf32>
    %122 = vector.broadcast %121 : vector<1x32xf32> to vector<20x32xf32>
    %123 = arith.addf %120, %122 : vector<20x32xf32>
    %c2_77 = arith.constant 2 : index
    %c40 = arith.constant 40 : index
    %124 = vector.load %arg1[%c2_77, %c40] : memref<24x80xf32, #tpu.memory_space<vmem>>, vector<16x32xf32>
    %125 = vector.extract_strided_slice %123 {offsets = [0, 0], sizes = [16, 32], strides = [1, 1]} : vector<20x32xf32> to vector<16x32xf32>
    %126 = arith.addf %125, %124 : vector<16x32xf32>
    %cst_78 = arith.constant 0.000000e+00 : f32
    %127 = vector.broadcast %cst_78 : f32 to vector<16x32xf32>
    %128 = arith.maximumf %126, %127 : vector<16x32xf32>
    %c0_79 = arith.constant 0 : index
    %c32_80 = arith.constant 32 : index
    %129 = vector.load %arg6[%c0_79, %c32_80] : memref<16x64xf32, #tpu.memory_space<vmem>>, vector<16x32xf32>
    tpu.vector_store %arg6[%c0_79, %c32_80], %128 {strides = array<i32>} : memref<16x64xf32, #tpu.memory_space<vmem>>, vector<16x32xf32>,
    return
  }
  func.func @transform_0(%arg0: i32) -> (i32, i32) {
    %c0_i32 = arith.constant 0 : i32
    %c0_i32_0 = arith.constant 0 : i32
    return %arg0, %c0_i32 : i32, i32
  }
  func.func @transform_1(%arg0: i32) -> (i32, i32, i32) {
    %c0_i32 = arith.constant 0 : i32
    %c0_i32_0 = arith.constant 0 : i32
    %c0_i32_1 = arith.constant 0 : i32
    %c0_i32_2 = arith.constant 0 : i32
    return %c0_i32, %c0_i32_0, %c0_i32_1 : i32, i32, i32
  }
  func.func @transform_2(%arg0: i32) -> (i32, i32, i32) {
    %c0_i32 = arith.constant 0 : i32
    %c0_i32_0 = arith.constant 0 : i32
    %c0_i32_1 = arith.constant 0 : i32
    %c0_i32_2 = arith.constant 0 : i32
    return %c0_i32, %c0_i32_0, %c0_i32_1 : i32, i32, i32
  }
  func.func @transform_3(%arg0: i32) -> (i32, i32) {
    %c0_i32 = arith.constant 0 : i32
    %c0_i32_0 = arith.constant 0 : i32
    %c0_i32_1 = arith.constant 0 : i32
    return %c0_i32, %c0_i32_0 : i32, i32
  }
  func.func @transform_4(%arg0: i32) -> (i32, i32) {
    %c0_i32 = arith.constant 0 : i32
    %c0_i32_0 = arith.constant 0 : i32
    %c0_i32_1 = arith.constant 0 : i32
    return %c0_i32, %c0_i32_0 : i32, i32
  }
  func.func @transform_5(%arg0: i32) -> (i32, i32) {
    %c0_i32 = arith.constant 0 : i32
    %c0_i32_0 = arith.constant 0 : i32
    return %arg0, %c0_i32 : i32, i32
  }
}

</mosaic_0001>

<bundles_post_ra>
// kernel: tpu_custom_call.1
= control target key start
LH: loop header
LB: loop body
LE: loop exit
PB: predicated region body
PF: predicated region fallthrough
CT: control target
= control target key end

     0   :  { %10 = vsyncpa [#allocation3], 0  ;;  %s2891_s0 = inlined_call_operand.vmem [shape: f32[48,80], index: 0, kind: input, shape index: {}]   ;;  %s2892_s1 = inlined_call_operand.vmem [shape: f32[3,48,40], index: 1, kind: input, shape index: {}]   ;;  %s2893_s2 = inlined_call_operand.vmem [shape: f32[3,40,32], index: 2, kind: input, shape index: {}]   ;;  %s2894_s3 = inlined_call_operand.vmem [shape: f32[1,40], index: 3, kind: input, shape index: {}]   ;;  %s2895_s4 = inlined_call_operand.vmem [shape: f32[1,32], index: 4, kind: input, shape index: {}]   ;;  %s2896_s5 = inlined_call_operand.hbm [shape: f32[32,64], index: 5, kind: output, shape index: {}]  }
   0x1   :  { %12 = vsyncpa [#allocation3 + $0x1], 0  ;;  %s2354_s18 = smov 0   ;;  %s2356_s19 = smov 0  }
   0x2   :  { %s2358_s20 = smov 0   ;;  %s2360_s21 = smov 0  }
   0x3 LB: > { %s2375_s22 = sadd.s32 4294967295, %s2312_s21   ;;  %s1668_s23 = sadd.s32 4294967294, %s2312_s21   ;;  %s2312_s21 = sphi %s2360_s21, %s2908_s21   ;;  %s2308_s20 = sphi %s2358_s20, %s2907_s20   ;;  %s2304_s19 = sphi %s2356_s19, %s2906_s19   ;;  %s2300_s18 = sphi %s2354_s18, %s2905_s18  }
   0x4   : > { %s2379_s24 = sadd.s32 1, %s2312_s21   ;;  %s135_s25 = sadd.s32 1, %s2308_s20 }
   0x5   : > { %s132_s26 = ssub.s32 %s2312_s21, %s2379_s24  ;;  %p145_p0 = scmp.ne.s32.totalorder %s2308_s20, %s2304_s19 }
   0x6   : > { %p133_p1 = scmp.eq.s32.totalorder %s132_s26, 0  ;;  %p146_p2 = scmp.eq.s32.totalorder %s2375_s22, 1 }
   0x7   : > { %p151_p3 = scmp.ne.s32.totalorder %s2304_s19, %s2300_s18  ;;  %p152_p4 = scmp.eq.s32.totalorder %s1668_s23, 1 }
   0x8   : > { %s2390_s27 = scalar_select %p133_p1, %s2308_s20, %s135_s25  }
   0x9   : > { %p2392_p5 = por %p146_p2, %p145_p0  ;;  %p2396_p6 = por %p152_p4, %p151_p3 }
   0xa   : > { %p1671_p7 = scmp.ge.s32.totalorder %s2312_s21, 1  ;;  %p191_p8 = scmp.lt.s32.totalorder %s2312_s21, 3 }
   0xc   : > { %p192_p9 = pnand %p1671_p7, %p191_p8 }
   0xd   : > { %v1674_v0 = vld [vmem:[%s2892_s1 + $0x30] sm:$0xff] (!%p192_p9)  ;;  %v1675_v1 = vld [vmem:[%s2892_s1 + $0x38] sm:$0xff] (!%p192_p9)  ;;  %v293_v2 = vld [vmem:[%s2892_s1] sm:$0xff] (!%p192_p9)  ;;  %v2314_v3 = vmov (!%p192_p9), 0.0|0.0   ;;  %s219_s17 = smul.u32 (!%p192_p9), 3, %s2375_s22  ;;  %vm2315_vm0 = vmmov (!%p192_p9), 0   ;;  %v226_v55 = vlaneseq (!%p192_p9) }
   0xe   : > { %195 = sbr.rel (%p192_p9) target bundleno = 885 (0x375), region = 40  ;;  %2106 = vmatprep.subr.bf16.mxu0 (!%p192_p9), %v2314_v3  ;;  %v2412_v4 = vpack.c.bf16 (!%p192_p9), %v1675_v1, %v1674_v0  ;;  %2115 = vmatprep.subr.bf16.mxu1 (!%p192_p9), %v2314_v3  ;;  %v294_v5 = vld [vmem:[%s2892_s1 + $0x8] sm:$0xff] (!%p192_p9)  ;;  %v1676_v6 = vld [vmem:[%s2892_s1 + $0x40] sm:$0xff] (!%p192_p9)  ;;  %v295_v9 = vld [vmem:[%s2892_s1 + $0x10] sm:$0xff] (!%p192_p9)  ;;  %v2316_v11 = vmov (!%p192_p9), 0.0   ;;  %s2317_s6 = smov (!%p192_p9), 96  }
   0xf   : > { %v1677_v7 = vld [vmem:[%s2892_s1 + $0x48] sm:$0xff] (!%p192_p9)  ;;  %v2425_v8 = vpack.c.bf16 (!%p192_p9), %v294_v5, %v293_v2  ;;  %v296_v10 = vld [vmem:[%s2892_s1 + $0x18] sm:$0xff] (!%p192_p9)  ;;  %1878 = vmatprep.mubr.msk.f32.mxu0 (!%p192_p9), %vm2315_vm0, %v2316_v11  ;;  %1899 = vmatprep.mubr.msk.f32.mxu1 (!%p192_p9), %vm2315_vm0, %v2316_v11  ;;  %p220_p10 = scmp.lt.s32.totalorder (!%p192_p9), %s219_s17, 5  ;;  %v1678_v14 = vld [vmem:[%s2892_s1 + $0x50] sm:$0xff] (!%p192_p9)  ;;  %vm309_vm1 = vcmask (!%p192_p9), 392192   ;;  %v227_v56 = vshrl.u32 (!%p192_p9), %v226_v55, 7 }
  0x10   : > { %2108 = vmatpush3.bf16.msra.mxu0 (!%p192_p9), %v2412_v4  ;;  %v2438_v12 = vpack.c.bf16 (!%p192_p9), %v1677_v7, %v1676_v6  ;;  %v2442_v13 = vpack.c.bf16 (!%p192_p9), %v296_v10, %v295_v9  ;;  %v1679_v15 = vld [vmem:[%s2892_s1 + $0x58] sm:$0xff] (!%p192_p9)  ;;  %v297_v16 = vld [vmem:[%s2892_s1 + $0x20] sm:$0xff] (!%p192_p9)  ;;  %v298_v17 = vld [vmem:[%s2892_s1 + $0x28] sm:$0xff] (!%p192_p9)  ;;  %s1763_s7 = sshll.u32 (!%p192_p9), %s2375_s22, 8  ;;  %s2321_s22 = smov (!%p192_p9), [#allocation2]  }
  0x11   : > { %2117 = vmatpush3.bf16.msra.mxu1 (!%p192_p9), %v2425_v8  ;;  %2109 = vmatprep.subr.bf16.mxu0 (!%p192_p9), %v2314_v3  ;;  %v2458_v18 = vpack.c.bf16 (!%p192_p9), %v1679_v15, %v1678_v14  ;;  %v2462_v19 = vpack.c.bf16 (!%p192_p9), %v298_v17, %v297_v16  ;;  %v1686_v20 = vld [vmem:[%s2892_s1 + $0x60] sm:$0xff] (!%p192_p9)  ;;  %v1687_v21 = vld [vmem:[%s2892_s1 + $0x68] sm:$0xff] (!%p192_p9)  ;;  %v1688_v24 = vld [vmem:[%s2892_s1 + $0x70] sm:$0xff] (!%p192_p9)  ;;  %v228_v57 = vadd.s32 (!%p192_p9), 8, %v227_v56  ;;  %v230_v58 = vadd.s32 (!%p192_p9), 1, %v227_v56  ;;  %s2843_s11 = scalar_lea.hbm (!%p192_p9), %s2896_s5, %s1763_s7 }
  0x12   : > { %2118 = vmatprep.subr.bf16.mxu1 (!%p192_p9), %v2314_v3  ;;  %v2479_v23 = vpack.c.bf16 (!%p192_p9), %v1687_v21, %v1686_v20  ;;  %v1689_v26 = vld [vmem:[%s2892_s1 + $0x78] sm:$0xff] (!%p192_p9)  ;;  %v1690_v31 = vld [vmem:[%s2892_s1 + $0x80] sm:$0xff] (!%p192_p9)  ;;  %v1691_v32 = vld [vmem:[%s2892_s1 + $0x88] sm:$0xff] (!%p192_p9)  ;;  %v229_v59 = vadd.s32 (!%p192_p9), 16, %v227_v56 }
  0x13   : > { %v2498_v29 = vpack.c.bf16 (!%p192_p9), %v1689_v26, %v1688_v24  ;;  %v2519_v35 = vpack.c.bf16 (!%p192_p9), %v1691_v32, %v1690_v31  ;;  %v620_v41 = vld [vmem:[%s2893_s2] sm:$0xff] (!%p192_p9)  ;;  %v621_v42 = vld [vmem:[%s2893_s2 + $0x8] sm:$0xff] (!%p192_p9)  ;;  %v622_v44 = vld [vmem:[%s2893_s2 + $0x10] sm:$0xff] (!%p192_p9)  ;;  %v231_v60 = vadd.s32 (!%p192_p9), 1, %v228_v57 }
  0x14   : > { %2111 = vmatpush3.bf16.msra.mxu0 (!%p192_p9), %v2438_v12  ;;  %v2558_v43 = vpack.c.bf16 (!%p192_p9), %v621_v42, %v620_v41  ;;  %v623_v45 = vld [vmem:[%s2893_s2 + $0x18] sm:$0xff] (!%p192_p9)  ;;  %v1696_v47 = vld [vmem:[%s2893_s2 + $0x28] sm:$0xff] (!%p192_p9)  ;;  %v1697_v48 = vld [vmem:[%s2893_s2 + $0x30] sm:$0xff] (!%p192_p9)  ;;  %v2606_v61 = vmul.u32.u64.low (!%p192_p9), 2863311531, %v230_v58  ;;  %v2607_v62 = vmul.u32.u64.high 2863311531, %v230_v58, %v2606_v61  ;;  %v232_v63 = vadd.s32 (!%p192_p9), 1, %v229_v59 }
  0x15   : > { %s2910_s17 = smov (!%p220_p10, %s219_s17), 5  ;;  %2120 = vmatpush3.bf16.msra.mxu1 %v2442_v13  ;;  %2112 = vmatprep.subr.bf16.mxu0 %v2314_v3  ;;  %v2568_v46 = vpack.c.bf16 %v623_v45, %v622_v44  ;;  %v2577_v49 = vpack.c.bf16 %v1697_v48, %v1696_v47  ;;  %v2584_v50 = vld [vmem:[%s2893_s2 + $0x20] sm:$0xff]  ;;  %v1698_v51 = vld [vmem:[%s2893_s2 + $0x38] sm:$0xff]  ;;  %v2602_v54 = vld [vmem:[%s2893_s2 + $0x48] sm:$0xff]  ;;  %v2609_v0 = vmul.u32.u64.low 2863311531, %v231_v60  ;;  %v2610_v1 = vmul.u32.u64.high 2863311531, %v231_v60, %v2609_v0 }
  0x16   : > { %s1673_s14 = sshll.u32 %s2910_s17, 3  ;;  %2121 = vmatprep.subr.bf16.mxu1 %v2314_v3  ;;  %v1699_v52 = vld [vmem:[%s2893_s2 + $0x40] sm:$0xff]  ;;  %s2319_s17 = smov 120   ;;  %v239_v2 = vshrl.u32 %v2607_v62, 4  ;;  %v2613_v5 = vmul.u32.u64.low 2863311531, %v232_v63  ;;  %v2614_v6 = vmul.u32.u64.high 2863311531, %v232_v63, %v2613_v5 }
  0x17   : > { %s2467_s23 = scalar_lea.vmem %s2891_s0, %s1673_s14  ;;  %v2594_v53 = vpack.c.bf16 %v1699_v52, %v1698_v51  ;;  %v250_v9 = vshrl.u32 %v2610_v1, 4  ;;  %v2621_v44 = vld [vmem:[%s2894_s3] ss:$0 sm:$0xff]  ;;  %v2623_v45 = vand.u32 127, %v226_v55  ;;  %s2254_s14 = sshll.u32 %s2321_s22, 4  ;;  %s2255_s14 = int_to_ptr.vmem [resolvable:$false] %s2254_s14 }
  0x18   : > { %v299_v22 = vld [vmem:[%s2467_s23 + $0x1] sm:$0xff]  ;;  %2114 = vmatpush3.bf16.msra.mxu0 %v2458_v18  ;;  %v947_v27 = vld [vmem:[%s2467_s23 + $0x11] sm:$0x3f]  ;;  %v300_v28 = vld [vmem:[%s2467_s23 + $0x9] sm:$0xff]  ;;  %v240_v7 = vmul.u32 24, %v239_v2  ;;  %v261_v16 = vshrl.u32 %v2614_v6, 4 }
  0x19   : > { %957 = vrot.lane.b32.xlu0 %v299_v22, %s2317_s6  ;;  %2123 = vmatpush3.bf16.msra.mxu1 %v2462_v19  ;;  %v290_v25 = vld [vmem:[%s2467_s23] sm:$0xff]  ;;  %v291_v30 = vld [vmem:[%s2467_s23 + $0x8] sm:$0xff]  ;;  %v301_v34 = vld [vmem:[%s2467_s23 + $0x11] sm:$0x3f]  ;;  %v251_v15 = vmul.u32 24, %v250_v9  ;;  %vm614_vm14 = vcmp.ge.s32.totalorder %v2623_v45, 4 }
  0x1a   : > { %2124 = vmatprep.subr.bf16.mxu0 %v2314_v3  ;;  %961 = vrot.lane.b32.xlu1 %v947_v27, %s2317_s6  ;;  %v488_v33 = vld [vmem:[%s2467_s23 + $0x2] sm:$0xff]  ;;  %v292_v36 = vld [vmem:[%s2467_s23 + $0x10] sm:$0x3f]  ;;  %v241_v14 = vsub.s32 %v230_v58, %v240_v7  ;;  %v262_v26 = vmul.u32 24, %v261_v16  ;;  %s2256_s15 = scalar_lea.vmem %s2255_s14, 512 }
  0x1b   : > { %2133 = vmatprep.subr.bf16.mxu1 %v2314_v3  ;;  %1879 = vmatmul.mubr.msk.f32.vlgmr.msra.gmra.mrb[0].mxu0 %vm309_vm1, %v299_v22  ;;  %v489_v37 = vld [vmem:[%s2467_s23 + $0xa] sm:$0xff]  ;;  %v1146_v39 = vld [vmem:[%s2467_s23 + $0x12] sm:$0x3f] }
  0x1c   : > { %1900 = vmatmul.mubr.msk.f32.vlgmr.msra.gmra.mrb[0].mxu1 %vm309_vm1, %v290_v25  ;;  %2126 = vmatpush3.bf16.msra.mxu0 %v2479_v23  ;;  %v938_v38 = vld [vmem:[%s2467_s23 + $0x10] sm:$0x3f]  ;;  %vm266_vm2 = vcmp.ne.s32.totalorder %v241_v14, 0  ;;  %vm269_vm3 = vcmp.lt.s32.totalorder %v241_v14, 0  ;;  %v275_v32 = vadd.s32 24, %v241_v14 }
  0x1d   : > { %959 = vrot.lane.b32.xlu0 %v300_v28, %s2317_s6  ;;  %1881 = vmatprep.mubr.msk.f32.mxu0 %vm2315_vm0, %v2316_v11  ;;  %v490_v40 = vld [vmem:[%s2467_s23 + $0x12] sm:$0x3f]  ;;  %s2318_s23 = smov 88   ;;  %vm272_vm4 = vmand %vm269_vm3, %vm266_vm2  ;;  %vm640_vm3 = vcmask 326656  }
  0x1e   : > { %1902 = vmatprep.mubr.msk.f32.mxu1 %vm2315_vm0, %v2316_v11  ;;  %2127 = vmatprep.subr.bf16.mxu0 %v2314_v3  ;;  %v1707_v9 = vld [vmem:[%s2893_s2 + $0x50] sm:$0xff] }
  0x1f   : > { %1052 = vrot.lane.b32.xlu1 %v290_v25, %s2317_s6  ;;  %1882 = vmatmul.mubr.msk.f32.gmra.mrb[2].mxu0 %vm309_vm1, %v300_v28  ;;  %v252_v25 = vsub.s32 %v231_v60, %v251_v15 }
  0x20   : > { %1903 = vmatmul.mubr.msk.f32.gmra.mrb[2].mxu1 %vm309_vm1, %v291_v30  ;;  %2129 = vmatpush3.bf16.msra.mxu0 %v2498_v29 }
  0x21   : > { %1156 = vrot.lane.b32.xlu0 %v488_v33, %s2317_s6  ;;  %1884 = vmatprep.mubr.msk.f32.mxu0 %vm2315_vm0, %v2316_v11  ;;  %vm267_vm5 = vcmp.ne.s32.totalorder %v252_v25, 0  ;;  %vm270_vm6 = vcmp.lt.s32.totalorder %v252_v25, 0  ;;  %v276_v41 = vadd.s32 24, %v252_v25 }
  0x22   : > { %1905 = vmatprep.mubr.msk.f32.mxu1 %vm2315_vm0, %v2316_v11  ;;  %2130 = vmatprep.subr.bf16.mxu0 %v2314_v3  ;;  %vm273_vm7 = vmand %vm270_vm6, %vm267_vm5 }
  0x23   : > { %1054 = vrot.lane.b32.xlu1 %v291_v30, %s2317_s6  ;;  %1885 = vmatmul.mubr.msk.f32.gmra.mrb[4].mxu0 %vm309_vm1, %v301_v34  ;;  %v263_v34 = vsub.s32 %v232_v63, %v262_v26  ;;  %v279_v51 = vsel %vm273_vm7, %v276_v41, %v252_v25  ;;  %vm634_vm7 = vcmask 1046528   ;;  %v1709_v26 = vld [vmem:[%s2893_s2 + $0x60] sm:$0xff] }
  0x24   : > { %1906 = vmatmul.mubr.msk.f32.gmra.mrb[4].mxu1 %vm309_vm1, %v292_v36  ;;  %2132 = vmatpush3.bf16.msra.mxu0 %v2519_v35  ;;  %vm282_vm15 = vcmp.ge.s32.totalorder %v279_v51, 2  ;;  %vm285_vm2 = vcmp.lt.s32.totalorder %v279_v51, 18 }
  0x25   : > { %1158 = vrot.lane.b32.xlu0 %v489_v37, %s2317_s6  ;;  %1920 = vmatprep.mubr.msk.f32.mxu0 %vm2315_vm0, %v2316_v11  ;;  %vm268_vm8 = vcmp.ne.s32.totalorder %v263_v34, 0  ;;  %vm271_vm9 = vcmp.lt.s32.totalorder %v263_v34, 0  ;;  %v277_v52 = vadd.s32 24, %v263_v34 }
  0x26   : > { %2139 = vmatprep.subr.bf16.mxu0 %v2314_v3  ;;  %1939 = vmatprep.mubr.msk.f32.mxu1 %vm2315_vm0, %v2316_v11  ;;  %vm274_vm12 = vmand %vm271_vm9, %vm268_vm8  ;;  %vm817_vm9 = vcmask 1045504  }
  0x27   : > { %1056 = vrot.lane.b32.xlu1 %v938_v38, %s2317_s6  ;;  %1921 = vmatmul.mubr.msk.f32.vlgmr.msra.gmra.mrb[6].mxu0 %vm309_vm1, %v488_v33  ;;  %v280_v61 = vsel %vm274_vm12, %v277_v52, %v263_v34 }
  0x28   : > { %1923 = vmatprep.mubr.msk.f32.mxu0 %vm2315_vm0, %v2316_v11  ;;  %2141 = vmatpush3.bf16.msra.mxu0 %v2558_v43  ;;  %vm283_vm5 = vcmp.ge.s32.totalorder %v280_v61, 2  ;;  %vm286_vm6 = vcmp.lt.s32.totalorder %v280_v61, 18 }
  0x29   : > { %1160 = vrot.lane.b32.xlu0 %v1146_v39, %s2317_s6  ;;  %2142 = vmatprep.subr.bf16.mxu0 %v2314_v3  ;;  %v278_v39 = vsel %vm272_vm4, %v275_v32, %v241_v14  ;;  %vm2636_vm4 = vmand %vm282_vm15, %vm285_vm2  ;;  %s2320_s6 = smov 32  }
  0x2a   : > { %2135 = vmatpush3.bf16.msra.mxu1 %v2577_v49  ;;  %vm281_vm10 = vcmp.ge.s32.totalorder %v278_v39, 2  ;;  %vm284_vm11 = vcmp.lt.s32.totalorder %v278_v39, 18  ;;  %vm2656_vm8 = vmand %vm283_vm5, %vm286_vm6 }
  0x2b   : > { %1924 = vmatmul.mubr.msk.f32.gmra.mrb[8].mxu0 %vm309_vm1, %v489_v37  ;;  %2136 = vmatprep.subr.bf16.mxu1 %v2314_v3  ;;  %vm2626_vm13 = vmand %vm281_vm10, %vm284_vm11  ;;  %vm1267_vm10 = vcmp.lt.s32.totalorder %v2623_v45, 36 }
  0x2c   : > { %1926 = vmatprep.mubr.msk.f32.mxu0 %vm2315_vm0, %v2316_v11  ;;  %2144 = vmatpush3.bf16.msra.mxu0 %v2568_v46 }
  0x2d   : > { %1956 = vmatprep.subr.mxu0 %v2316_v11  ;;  %1571 = vrot.lane.b32.xlu1 %v488_v33, %s2318_s23 }
  0x2e   : > { %2138 = vmatpush3.bf16.msra.mxu1 %v2594_v53  ;;  %1573 = vrot.lane.b32.xlu0 %v489_v37, %s2318_s23  ;;  %s216_s23 = sand.u32 1, %s2304_s19  }
  0x2f   : > { %1927 = vmatmul.mubr.msk.f32.gmra.mrb[10].mxu0 %vm309_vm1, %v490_v40  ;;  %1937 = vmatprep.subr.mxu1 %v2316_v11  ;;  %s2850_s12 = scalar_lea.sflag [#allocation3], %s216_s23 }
  0x30   : > { %1958 = vmatprep.mubr.msk.f32.mxu0 %vm2315_vm0, %v2316_v11  ;;  %1957 = vmatpush3.msra.mxu0 %v2584_v50 }
  0x31   : > { %2151 = vmatprep.subr.bf16.mxu0 %v2314_v3  ;;  %923 = vrot.lane.b32.xlu1 %v488_v33, %s2319_s17 }
  0x32   : > { %1938 = vmatpush3.msra.mxu1 %v2602_v54  ;;  %925 = vrot.lane.b32.xlu0 %v489_v37, %s2319_s17  ;;  %s1672_s17 = sshll.u32 %s216_s23, 4 }
  0x33   : > { %2145 = vmatprep.subr.bf16.mxu1 %v2314_v3  ;;  %s2781_s30 = scalar_lea.vmem [#allocation2], %s1672_s17 }
  0x34   : > { %s1606_s8 = sshll.u32 %s2781_s30, 4  ;;  %s2845_s8 = int_to_ptr.vmem [resolvable:$true] %s1606_s8 }
  0x35   : > { %s2250_s13 = scalar_lea.vmem %s2845_s8, 256  ;;  %p2257_p0 = scmp.lt.s32.totalorder %s2845_s8, %s2255_s14 }
  0x36   : > { %p2251_p11 = scmp.ne.s32.totalorder %s2845_s8, %s2250_s13  ;;  %p2258_p1 = scmp.lt.s32.totalorder %s2256_s15, %s2250_s13 }
  0x38   : > { %p2252_p12 = pnand %p2251_p11, %p2392_p5  ;;  %p2259_p2 = por %p2258_p1, %p2257_p0 }
  0x3a   : > { %p2253_p13 = pneg %p2252_p12 }
  0x3c   : > { %p2260_p3 = pnand %p2259_p2, %p2253_p13 }
  0xee   : > { %v385_v10 = vpop.f32.mrb[0].mxu0 }
  0xef   : > { %v1880_v17 = vpop.f32.mrb[1].mxu0  ;;  %v474_v20 = vpop.f32.mrb[0].mxu1 }
  0xf0   : > { %v475_v21 = vadd.f32 %v474_v20, %v385_v10  ;;  %v1901_v22 = vpop.f32.mrb[1].mxu1  ;;  %v1708_v10 = vld [vmem:[%s2893_s2 + $0x58] sm:$0xff] }
  0xf2   : > { %v390_v24 = vpop.f32.mrb[2].mxu0 }
  0xf3   : > { %v1883_v27 = vpop.f32.mrb[3].mxu0  ;;  %v479_v28 = vpop.f32.mrb[2].mxu1 }
  0xf4   : > { %v480_v30 = vadd.f32 %v479_v28, %v390_v24  ;;  %v1904_v31 = vpop.f32.mrb[3].mxu1  ;;  %v1710_v27 = vld [vmem:[%s2893_s2 + $0x68] sm:$0xff] }
  0xf6   : > { %v395_v33 = vpop.f32.mrb[4].mxu0 }
  0xf7   : > { %v1886_v36 = vpop.f32.mrb[5].mxu0  ;;  %v484_v37 = vpop.f32.mrb[4].mxu1 }
  0xf8   : > { %v485_v38 = vadd.f32 %v484_v37, %v395_v33  ;;  %v1907_v40 = vpop.f32.mrb[5].mxu1  ;;  %v958_v36 = vpop.permute.xlu0 %957 }
  0xf9   : > { %v962_v40 = vpop.permute.xlu1 %961 }
  0xfa   : > { %v573_v42 = vpop.f32.mrb[6].mxu0 }
  0xfb   : > { %v587_v47 = vadd.f32 %v573_v42, %v475_v21  ;;  %v1922_v48 = vpop.f32.mrb[7].mxu0  ;;  %v2660_v21 = vpack.c.bf16 %v1708_v10, %v1707_v9 }
  0xfc   : > { %v960_v39 = vpop.permute.xlu0 %959 }
  0xfd   : > { %v597_v56 = vadd.f32 %v2621_v44, %v587_v47 }
  0xfe   : > { %v578_v58 = vpop.f32.mrb[8].mxu0 }
  0xff   : > { %v600_v55 = vmax.f32 %v597_v56, 0.0  ;;  %v588_v59 = vadd.f32 %v578_v58, %v480_v30  ;;  %v1925_v60 = vpop.f32.mrb[9].mxu0 }
 0x101   : > { %v609_v62 = vsel %vm2626_vm13, %v600_v55, 0.0  ;;  %v598_v63 = vadd.f32 %v2621_v44, %v588_v59 }
 0x102   : > { %v617_v0 = vsel %vm614_vm14, %v609_v62, 0.0  ;;  %v583_v1 = vpop.f32.mrb[10].mxu0 }
 0x103   : > { %v601_v5 = vmax.f32 %v598_v63, 0.0  ;;  %v589_v6 = vadd.f32 %v583_v1, %v485_v38  ;;  %v1928_v7 = vpop.f32.mrb[11].mxu0  ;;  %1959 = vmatmul.mubr.msk.f32.vlgmr.msra.gmra.mrb[12].mxu0 %vm640_vm3, %v617_v0  ;;  %v635_v16 = vrot.slane %v617_v0, 1  ;;  %v2774_v1 = vld [vmem:[%s2895_s4] ss:$0 sm:$0xff] }
 0x104   : > { %1961 = vmatprep.mubr.msk.f32.mxu0 %vm2315_vm0, %v2316_v11  ;;  %2153 = vmatpush3.bf16.msra.mxu0 %v2412_v4  ;;  %v818_v4 = vrot.slane %v617_v0, 2 }
 0x105   : > { %v599_v14 = vadd.f32 %v2621_v44, %v589_v6  ;;  %v610_v15 = vsel %vm2636_vm4, %v601_v5, 0.0  ;;  %2154 = vmatprep.subr.bf16.mxu0 %v2314_v3 }
 0x106   : > { %v618_v17 = vsel %vm614_vm14, %v610_v15, 0.0 }
 0x107   : > { %v602_v22 = vmax.f32 %v599_v14, 0.0  ;;  %v636_v24 = vrot.slane %v618_v17, 1  ;;  %1962 = vmatmul.mubr.msk.f32.gmra.mrb[14].mxu0 %vm640_vm3, %v618_v17  ;;  %v819_v25 = vrot.slane %v618_v17, 2 }
 0x108   : > { %1964 = vmatprep.mubr.msk.f32.mxu0 %vm2315_vm0, %v2316_v11  ;;  %2156 = vmatpush3.bf16.msra.mxu0 %v2438_v12  ;;  %v2682_v12 = vpack.c.bf16 %v1710_v27, %v1709_v26 }
 0x109   : > { %v637_v28 = vsel %vm634_vm7, %v635_v16, %v636_v24  ;;  %v611_v30 = vsel %vm2656_vm8, %v602_v22, 0.0  ;;  %2157 = vmatprep.subr.bf16.mxu0 %v2314_v3  ;;  %v820_v31 = vsel %vm817_vm9, %v818_v4, %v819_v25 }
 0x10a   : > { %1940 = vmatmul.mubr.msk.f32.vlgmr.msra.gmra.mrb[6].mxu1 %vm640_vm3, %v637_v28  ;;  %v619_v32 = vsel %vm614_vm14, %v611_v30, 0.0 }
 0x10b   : > { %v638_v33 = vrot.slane %v619_v32, 1  ;;  %1965 = vmatmul.mubr.msk.f32.gmra.mrb[16].mxu0 %vm640_vm3, %v619_v32  ;;  %v821_v34 = vrot.slane %v619_v32, 2  ;;  %2147 = vmatpush3.bf16.msra.mxu1 %v2660_v21 }
 0x10c   : > { %1942 = vmatprep.mubr.msk.f32.mxu1 %vm2315_vm0, %v2316_v11  ;;  %2148 = vmatprep.subr.bf16.mxu1 %v2314_v3 }
 0x10d   : > { %v639_v37 = vsel %vm634_vm7, %v636_v24, %v638_v33  ;;  %2159 = vmatpush3.bf16.msra.mxu0 %v2458_v18  ;;  %1998 = vmatprep.mubr.msk.f32.mxu0 %vm2315_vm0, %v2316_v11  ;;  %v822_v38 = vsel %vm817_vm9, %v819_v25, %v821_v34  ;;  %v2701_v18 = vld [vmem:[%s2893_s2 + $0x70] sm:$0xff] }
 0x10e   : > { %1943 = vmatmul.mubr.msk.f32.gmra.mrb[8].mxu1 %vm640_vm3, %v639_v37  ;;  %2169 = vmatprep.subr.bf16.mxu0 %v2314_v3 }
 0x10f   : > { %2150 = vmatpush3.bf16.msra.mxu1 %v2682_v12  ;;  %1945 = vmatprep.mubr.msk.f32.mxu1 %vm2315_vm0, %v2316_v11 }
 0x110   : > { %1975 = vmatprep.subr.mxu1 %v2316_v11  ;;  %1999 = vmatmul.mubr.msk.f32.vlgmr.msra.gmra.mrb[18].mxu0 %vm309_vm1, %v958_v36 }
 0x111   : > { %2001 = vmatprep.mubr.msk.f32.mxu0 %vm2315_vm0, %v2316_v11  ;;  %2171 = vmatpush3.bf16.msra.mxu0 %v2479_v23  ;;  %v1157_v23 = vpop.permute.xlu0 %1156 }
 0x112   : > { %1946 = vmatmul.mubr.msk.f32.gmra.mrb[10].mxu1 %vm640_vm3, %v638_v33  ;;  %2172 = vmatprep.subr.bf16.mxu0 %v2314_v3 }
 0x113   : > { %1976 = vmatpush3.msra.mxu1 %v2701_v18  ;;  %1977 = vmatprep.mubr.msk.f32.mxu1 %vm2315_vm0, %v2316_v11 }
 0x114   : > { %2160 = vmatprep.subr.bf16.mxu1 %v2314_v3  ;;  %2002 = vmatmul.mubr.msk.f32.gmra.mrb[20].mxu0 %vm309_vm1, %v960_v39 }
 0x115   : > { %2004 = vmatprep.mubr.msk.f32.mxu0 %vm2315_vm0, %v2316_v11  ;;  %2174 = vmatpush3.bf16.msra.mxu0 %v2498_v29  ;;  %v1159_v29 = vpop.permute.xlu0 %1158 }
 0x116   : > { %1978 = vmatmul.mubr.msk.f32.vlgmr.msra.gmra.mrb[12].mxu1 %vm640_vm3, %v820_v31  ;;  %2175 = vmatprep.subr.bf16.mxu0 %v2314_v3 }
 0x117   : > { %2162 = vmatpush3.bf16.msra.mxu1 %v2425_v8  ;;  %1980 = vmatprep.mubr.msk.f32.mxu1 %vm2315_vm0, %v2316_v11  ;;  %v1053_v8 = vpop.permute.xlu1 %1052 }
 0x118   : > { %2163 = vmatprep.subr.bf16.mxu1 %v2314_v3  ;;  %2005 = vmatmul.mubr.msk.f32.gmra.mrb[22].mxu0 %vm309_vm1, %v962_v40 }
 0x119   : > { %2177 = vmatpush3.bf16.msra.mxu0 %v2519_v35  ;;  %2040 = vmatprep.mubr.msk.f32.mxu0 %vm2315_vm0, %v2316_v11  ;;  %v1161_v35 = vpop.permute.xlu0 %1160 }
 0x11a   : > { %1981 = vmatmul.mubr.msk.f32.gmra.mrb[14].mxu1 %vm640_vm3, %v822_v38  ;;  %2184 = vmatprep.subr.bf16.mxu0 %v2314_v3 }
 0x11b   : > { %2165 = vmatpush3.bf16.msra.mxu1 %v2442_v13  ;;  %1983 = vmatprep.mubr.msk.f32.mxu1 %vm2315_vm0, %v2316_v11  ;;  %v1055_v13 = vpop.permute.xlu1 %1054 }
 0x11c   : > { %2166 = vmatprep.subr.bf16.mxu1 %v2314_v3  ;;  %2041 = vmatmul.mubr.msk.f32.vlgmr.msra.gmra.mrb[24].mxu0 %vm309_vm1, %v1157_v23 }
 0x11d   : > { %2043 = vmatprep.mubr.msk.f32.mxu0 %vm2315_vm0, %v2316_v11  ;;  %2186 = vmatpush3.bf16.msra.mxu0 %v2558_v43  ;;  %v2769_v0 = vpop.permute.xlu0 %1573 }
 0x11e   : > { %1984 = vmatmul.mubr.msk.f32.gmra.mrb[16].mxu1 %vm640_vm3, %v821_v34  ;;  %2187 = vmatprep.subr.bf16.mxu0 %v2314_v3 }
 0x11f   : > { %2168 = vmatpush3.bf16.msra.mxu1 %v2462_v19  ;;  %2019 = vmatprep.mubr.msk.f32.mxu1 %vm2315_vm0, %v2316_v11  ;;  %v1057_v19 = vpop.permute.xlu1 %1056 }
 0x120   : > { %2044 = vmatmul.mubr.msk.f32.gmra.mrb[26].mxu0 %vm309_vm1, %v1159_v29  ;;  %2178 = vmatprep.subr.bf16.mxu1 %v2314_v3 }
 0x121   : > { %2046 = vmatprep.mubr.msk.f32.mxu0 %vm2315_vm0, %v2316_v11  ;;  %2189 = vmatpush3.bf16.msra.mxu0 %v2568_v46  ;;  %v926_v22 = vpop.permute.xlu0 %925 }
 0x122   : > { %2020 = vmatmul.mubr.msk.f32.vlgmr.msra.gmra.mrb[18].mxu1 %vm309_vm1, %v1053_v8  ;;  %2076 = vmatprep.subr.mxu0 %v2316_v11 }
 0x123   : > { %2022 = vmatprep.mubr.msk.f32.mxu1 %vm2315_vm0, %v2316_v11  ;;  %2180 = vmatpush3.bf16.msra.mxu1 %v2577_v49  ;;  %v2767_v59 = vpop.permute.xlu1 %1571 }
 0x124   : > { %2047 = vmatmul.mubr.msk.f32.gmra.mrb[28].mxu0 %vm309_vm1, %v1161_v35  ;;  %2181 = vmatprep.subr.bf16.mxu1 %v2314_v3 }
 0x125   : > { %2077 = vmatpush3.msra.mxu0 %v2584_v50  ;;  %2078 = vmatprep.mubr.msk.f32.mxu0 %vm2315_vm0, %v2316_v11 }
 0x126   : > { %2023 = vmatmul.mubr.msk.f32.gmra.mrb[20].mxu1 %vm309_vm1, %v1055_v13 }
 0x127   : > { %2025 = vmatprep.mubr.msk.f32.mxu1 %vm2315_vm0, %v2316_v11  ;;  %2183 = vmatpush3.bf16.msra.mxu1 %v2594_v53  ;;  %v924_v7 = vpop.permute.xlu1 %923 }
 0x128   : > { %2057 = vmatprep.subr.mxu1 %v2316_v11 }
 0x12a   : > { %2026 = vmatmul.mubr.msk.f32.gmra.mrb[22].mxu1 %vm309_vm1, %v1057_v19  ;;  %vm933_vm1 = vcmask 261120  }
 0x12b   : > { %2058 = vmatpush3.msra.mxu1 %v2602_v54  ;;  %2059 = vmatprep.mubr.msk.f32.mxu1 %vm2315_vm0, %v2316_v11 }
 0x12c   : > { %2190 = vmatprep.subr.bf16.mxu1 %v2314_v3 }
 0x1d6   : > { %v798_v43 = vpop.f32.mrb[12].mxu0 }
 0x1d7   : > { %v1960_v46 = vpop.f32.mrb[13].mxu0 }
 0x1da   : > { %v803_v49 = vpop.f32.mrb[14].mxu0 }
 0x1db   : > { %v1963_v50 = vpop.f32.mrb[15].mxu0 }
 0x1dd   : > { %v713_v41 = vpop.f32.mrb[6].mxu1 }
 0x1de   : > { %v799_v42 = vadd.f32 %v798_v43, %v713_v41  ;;  %v1941_v47 = vpop.f32.mrb[7].mxu1  ;;  %v808_v53 = vpop.f32.mrb[16].mxu0 }
 0x1df   : > { %v1966_v48 = vpop.f32.mrb[17].mxu0 }
 0x1e1   : > { %v718_v51 = vpop.f32.mrb[8].mxu1 }
 0x1e2   : > { %v804_v52 = vadd.f32 %v803_v49, %v718_v51  ;;  %v1944_v56 = vpop.f32.mrb[9].mxu1 }
 0x1e3   : > { %v1035_v54 = vpop.f32.mrb[18].mxu0 }
 0x1e4   : > { %v2000_v58 = vpop.f32.mrb[19].mxu0 }
 0x1e5   : > { %v723_v55 = vpop.f32.mrb[10].mxu1 }
 0x1e6   : > { %v1947_v60 = vpop.f32.mrb[11].mxu1 }
 0x1e7   : > { %v1040_v61 = vpop.f32.mrb[20].mxu0 }
 0x1e8   : > { %v2003_v62 = vpop.f32.mrb[21].mxu0 }
 0x1e9   : > { %v895_v63 = vpop.f32.mrb[12].mxu1 }
 0x1ea   : > { %v908_v5 = vadd.f32 %v895_v63, %v799_v42  ;;  %v1979_v6 = vpop.f32.mrb[13].mxu1 }
 0x1eb   : > { %v1045_v9 = vpop.f32.mrb[22].mxu0 }
 0x1ec   : > { %v917_v10 = vadd.f32 %v2774_v1, %v908_v5  ;;  %v2006_v14 = vpop.f32.mrb[23].mxu0 }
 0x1ed   : > { %v900_v15 = vpop.f32.mrb[14].mxu1 }
 0x1ee   : > { %v929_v16 = vadd.f32 %v924_v7, %v917_v10  ;;  %v909_v17 = vadd.f32 %v900_v15, %v804_v52  ;;  %v1982_v4 = vpop.f32.mrb[15].mxu1 }
 0x1ef   : > { %v1234_v24 = vpop.f32.mrb[24].mxu0 }
 0x1f0   : > { %v931_v25 = vmax.f32 %v929_v16, 0.0  ;;  %v918_v26 = vadd.f32 %v2774_v1, %v909_v17  ;;  %v2042_v27 = vpop.f32.mrb[25].mxu0 }
 0x1f1   : > { %v905_v28 = vpop.f32.mrb[16].mxu1 }
 0x1f2   : > { %934 = vst.msk [vmem:[%s2781_s30] sm:$0xff] %vm933_vm1, %v931_v25  ;;  %v930_v30 = vadd.f32 %v926_v22, %v918_v26  ;;  %v1985_v31 = vpop.f32.mrb[17].mxu1 }
 0x1f3   : > { %v1239_v32 = vpop.f32.mrb[26].mxu0 }
 0x1f4   : > { %v932_v33 = vmax.f32 %v930_v30, 0.0  ;;  %v2045_v34 = vpop.f32.mrb[27].mxu0 }
 0x1f5   : > { %v1130_v36 = vpop.f32.mrb[18].mxu1 }
 0x1f6   : > { %935 = vst.msk [vmem:[%s2781_s30 + $0x8] sm:$0xff] %vm933_vm1, %v932_v33  ;;  %v1131_v37 = vadd.f32 %v1130_v36, %v1035_v54  ;;  %v2021_v38 = vpop.f32.mrb[19].mxu1 }
 0x1f7   : > { %v1244_v39 = vpop.f32.mrb[28].mxu0 }
 0x1f8   : > { %v1248_v40 = vadd.f32 %v1234_v24, %v1131_v37  ;;  %v2048_v23 = vpop.f32.mrb[29].mxu0 }
 0x1f9   : > { %v1135_v8 = vpop.f32.mrb[20].mxu1 }
 0x1fa   : > { %v1258_v29 = vadd.f32 %v2621_v44, %v1248_v40  ;;  %v1136_v13 = vadd.f32 %v1135_v8, %v1040_v61  ;;  %v2024_v35 = vpop.f32.mrb[21].mxu1 }
 0x1fc   : > { %v1261_v19 = vmax.f32 %v1258_v29, 0.0  ;;  %v1249_v43 = vadd.f32 %v1239_v32, %v1136_v13 }
 0x1fd   : > { %v1140_v46 = vpop.f32.mrb[22].mxu1 }
 0x1fe   : > { %v1264_v49 = vsel %vm2626_vm13, %v1261_v19, 0.0  ;;  %v1259_v50 = vadd.f32 %v2621_v44, %v1249_v43  ;;  %v1141_v41 = vadd.f32 %v1140_v46, %v1045_v9  ;;  %v2027_v42 = vpop.f32.mrb[23].mxu1 }
 0x1ff   : > { %v1270_v47 = vsel %vm1267_vm10, %v1264_v49, 0.0 }
 0x200   : > { %v1262_v53 = vmax.f32 %v1259_v50, 0.0  ;;  %v1250_v48 = vadd.f32 %v1244_v39, %v1141_v41  ;;  %2079 = vmatmul.mubr.msk.f32.vlgmr.msra.gmra.mrb[30].mxu0 %vm640_vm3, %v1270_v47  ;;  %v1286_v52 = vrot.slane %v1270_v47, 1  ;;  %v1466_v54 = vrot.slane %v1270_v47, 2 }
 0x201   : > { %2081 = vmatprep.mubr.msk.f32.mxu0 %vm2315_vm0, %v2316_v11 }
 0x202   : > { %v1260_v51 = vadd.f32 %v2621_v44, %v1250_v48  ;;  %v1265_v57 = vsel %vm2636_vm4, %v1262_v53, 0.0 }
 0x203   : > { %v1271_v56 = vsel %vm1267_vm10, %v1265_v57, 0.0 }
 0x204   : > { %v1263_v58 = vmax.f32 %v1260_v51, 0.0  ;;  %v1287_v55 = vrot.slane %v1271_v56, 1  ;;  %2082 = vmatmul.mubr.msk.f32.gmra.mrb[32].mxu0 %vm640_vm3, %v1271_v56  ;;  %v1467_v60 = vrot.slane %v1271_v56, 2 }
 0x205   : > { %2084 = vmatprep.mubr.msk.f32.mxu0 %vm2315_vm0, %v2316_v11 }
 0x206   : > { %v1288_v61 = vsel %vm634_vm7, %v1286_v52, %v1287_v55  ;;  %v1266_v44 = vsel %vm2656_vm8, %v1263_v58, 0.0  ;;  %v1468_v2 = vsel %vm817_vm9, %v1466_v54, %v1467_v60 }
 0x207   : > { %2060 = vmatmul.mubr.msk.f32.vlgmr.msra.gmra.mrb[24].mxu1 %vm640_vm3, %v1288_v61  ;;  %v1272_v62 = vsel %vm1267_vm10, %v1266_v44, 0.0 }
 0x208   : > { %v1289_v63 = vrot.slane %v1272_v62, 1  ;;  %2085 = vmatmul.mubr.msk.f32.gmra.mrb[34].mxu0 %vm640_vm3, %v1272_v62  ;;  %v1469_v5 = vrot.slane %v1272_v62, 2  ;;  %2192 = vmatpush3.bf16.msra.mxu1 %v2660_v21 }
 0x209   : > { %2062 = vmatprep.mubr.msk.f32.mxu1 %vm2315_vm0, %v2316_v11  ;;  %2193 = vmatprep.subr.bf16.mxu1 %v2314_v3 }
 0x20a   : > { %v1290_v20 = vsel %vm634_vm7, %v1287_v55, %v1289_v63  ;;  %v1470_v6 = vsel %vm817_vm9, %v1467_v60, %v1469_v5 }
 0x20b   : > { %2063 = vmatmul.mubr.msk.f32.gmra.mrb[26].mxu1 %vm640_vm3, %v1290_v20 }
 0x20c   : > { %2195 = vmatpush3.bf16.msra.mxu1 %v2682_v12  ;;  %2065 = vmatprep.mubr.msk.f32.mxu1 %vm2315_vm0, %v2316_v11 }
 0x20d   : > { %2095 = vmatprep.subr.mxu1 %v2316_v11 }
 0x20f   : > { %2066 = vmatmul.mubr.msk.f32.gmra.mrb[28].mxu1 %vm640_vm3, %v1289_v63 }
 0x210   : > { %2096 = vmatpush3.msra.mxu1 %v2701_v18  ;;  %2097 = vmatprep.mubr.msk.f32.mxu1 %vm2315_vm0, %v2316_v11 }
 0x213   : > { %2098 = vmatmul.mubr.msk.f32.vlgmr.msra.gmra.mrb[30].mxu1 %vm640_vm3, %v1468_v2 }
 0x214   : > { %2100 = vmatprep.mubr.msk.f32.mxu1 %vm2315_vm0, %v2316_v11 }
 0x217   : > { %2101 = vmatmul.mubr.msk.f32.gmra.mrb[32].mxu1 %vm640_vm3, %v1470_v6 }
 0x218   : > { %2103 = vmatprep.mubr.msk.f32.mxu1 %vm2315_vm0, %v2316_v11  ;;  %vm1589_vm0 = vcmask 523520  }
 0x21b   : > { %2104 = vmatmul.mubr.msk.f32.gmra.mrb[34].mxu1 %vm640_vm3, %v1469_v5 }
 0x2d3   : > { %v1448_v3 = vpop.f32.mrb[30].mxu0 }
 0x2d4   : > { %v2080_v45 = vpop.f32.mrb[31].mxu0 }
 0x2d7   : > { %v1453_v21 = vpop.f32.mrb[32].mxu0 }
 0x2d8   : > { %v2083_v12 = vpop.f32.mrb[33].mxu0 }
 0x2da   : > { %v1363_v18 = vpop.f32.mrb[24].mxu1 }
 0x2db   : > { %v1449_v7 = vadd.f32 %v1448_v3, %v1363_v18  ;;  %v2061_v9 = vpop.f32.mrb[25].mxu1  ;;  %v1458_v10 = vpop.f32.mrb[34].mxu0 }
 0x2dc   : > { %v2086_v14 = vpop.f32.mrb[35].mxu0 }
 0x2de   : > { %v1368_v15 = vpop.f32.mrb[26].mxu1 }
 0x2df   : > { %v1454_v16 = vadd.f32 %v1453_v21, %v1368_v15  ;;  %v2064_v17 = vpop.f32.mrb[27].mxu1 }
 0x2e2   : > { %v1373_v4 = vpop.f32.mrb[28].mxu1 }
 0x2e3   : > { %v2067_v22 = vpop.f32.mrb[29].mxu1 }
 0x2e6   : > { %v1543_v24 = vpop.f32.mrb[30].mxu1 }
 0x2e7   : > { %v1556_v25 = vadd.f32 %v1543_v24, %v1449_v7  ;;  %v2099_v26 = vpop.f32.mrb[31].mxu1 }
 0x2e9   : > { %v1565_v11 = vadd.f32 %v2774_v1, %v1556_v25 }
 0x2ea   : > { %v1548_v27 = vpop.f32.mrb[32].mxu1 }
 0x2eb   : > { %v1557_v28 = vadd.f32 %v1548_v27, %v1454_v16  ;;  %v2102_v30 = vpop.f32.mrb[33].mxu1  ;;  %v1577_v31 = vadd.f32 %v2767_v59, %v1565_v11 }
 0x2ed   : > { %v1566_v32 = vadd.f32 %v2774_v1, %v1557_v28  ;;  %v1579_v33 = vmax.f32 %v1577_v31, 0.0 }
 0x2ee   : > { %v1553_v34 = vpop.f32.mrb[34].mxu1 }
 0x2ef   : > { %1583 = vrot.lane.b32.xlu1 %v1579_v33, %s2320_s6  ;;  %v2105_v36 = vpop.f32.mrb[35].mxu1  ;;  %v1578_v37 = vadd.f32 %v2769_v0, %v1566_v32 }
 0x2f1   : > { %v1580_v38 = vmax.f32 %v1578_v37, 0.0 }
 0x2f3   : > { %1585 = vrot.lane.b32.xlu0 %v1580_v38, %s2320_s6 }
 0x361   : > { %v1584_v39 = vpop.permute.xlu1 %1583 }
 0x362   : > { %1590 = vst.msk [vmem:[%s2781_s30] sm:$0xff] %vm1589_vm0, %v1584_v39 }
 0x365   : > { %v1586_v59 = vpop.permute.xlu0 %1585 }
 0x366   : > { %1591 = vst.msk [vmem:[%s2781_s30 + $0x8] sm:$0xff] %vm1589_vm0, %v1586_v59 }
 0x367   : > { %2263 = shalt.err (!%p2260_p3)
}
 0x368   : > { %s2264_s16 = scalar_lea.hbm %s2843_s11, 256  ;;  %s2268_s23 = scalar_lea.hbm %s2896_s5, 512 }
 0x369   : > { %p2265_p4 = scmp.ne.s32.totalorder %s2843_s11, %s2264_s16  ;;  %p2269_p9 = scmp.lt.u32.totalorder %s2843_s11, %s2896_s5 }
 0x36a   : > { %p2270_p10 = scmp.lt.u32.totalorder %s2268_s23, %s2264_s16  ;;  %p2272_p12 = scmp.lt.u32.totalorder %s2264_s16, %s2843_s11 }
 0x36b   : > { %p2266_p7 = pnand %p2265_p4, %p2392_p5 }
 0x36c   : > { %p2271_p11 = por %p2270_p10, %p2269_p9 }
 0x36d   : > { %p2267_p8 = pneg %p2266_p7 }
 0x36e   : > { %p2273_p13 = por %p2272_p12, %p2271_p11 }
 0x370   : > { %p2274_p0 = pnand %p2273_p13, %p2267_p8 }
 0x372   : > { %2277 = shalt.err (!%p2274_p0)
}
 0x373   : > { %s2322_s6 = smov 128   ;;  %s2323_s7 = smov 8  }
 0x374   : > { %2202 = dma.vmem_to_hbm [thread:$0]  (%p2392_p5), %s2845_s8, 256, %s2843_s11, %s2850_s12, %s2322_s6, %s2322_s6, %s2323_s7  }
 0x375 PF: > { %p2208_p1 = scmp.ge.s32.totalorder %s2312_s21, 2  ;;  %s1621_s9 = sand.u32 1, %s2300_s18  }
 0x376   : > { %s1622_s10 = scalar_lea.sflag [#allocation3], %s1621_s9 }
 0x377   : > { %p2205_p2 = pnand %p2208_p1, %p2396_p6 }
 0x379   : > { %2295 = dma.done.wait (!%p2205_p2), %s1622_s10, 256  }
 0x37a   : > { %2297 = vsyncadd (!%p2205_p2), %s1622_s10, 4294967040  ;;  %p15_p3 = scmp.ge.s32.totalorder %s2379_s24, 4   ;;  %s2905_s18 = smov %s2304_s19 }
 0x37b   : > { %s2906_s19 = smov %s2308_s20  ;;  %s2907_s20 = smov %s2390_s27 }
 0x37c   : > { %s2908_s21 = smov %s2379_s24  ;;  %17 = sbr.rel (!%p15_p3) target bundleno = 3 (0x3), region = 79 }
 0x383   :  { %1627 = vsyncpa [#allocation3], 1 }
 0x384   :  { %1629 = vsyncpa [#allocation3 + $0x1], 1 }

</bundles_post_ra>
